<compile_context>
chip_gen: v6e
topology: v6e:2x2x1
jax: 0.10.0
libtpu: 0.0.40
codegen_flags: <defaults>
</compile_context>

<pallas_src>
import functools

import jax
import jax.numpy as jnp
from jax.experimental import pallas as pl
from jax.experimental.pallas import tpu as pltpu


_PARALLEL_CHUNKS = 2  # max TensorCores per chip (v7x); costs nothing on 1-TC chips


def _center_loss2_kernel(tb, nrows_ref, feat_ref, label_ref,
                         dot_ref, a_ref, b_ref):
    """grid = (P parallel batch chunks, T row-tiles per chunk).

    The three (1,1) outputs keep the same block index across the inner
    ("arbitrary") axis, so they stay resident in VMEM and are used directly as
    accumulators: init at j == 0, accumulate every step, written back to HBM
    only when the chunk index changes.
    """
    i = pl.program_id(0)          # parallel chunk (megacore axis on v7x)
    j = pl.program_id(1)          # row-tile within the chunk (accumulation)

    @pl.when(j == 0)
    def _init():
        dot_ref[...] = jnp.zeros_like(dot_ref)
        a_ref[...] = jnp.zeros_like(a_ref)
        b_ref[...] = jnp.zeros_like(b_ref)

    # Cast narrow inputs (bf16/fp16) to f32 in-register; HBM traffic stays at
    # the native input width (no wrapper-side astype copy).
    feat = feat_ref[...].astype(jnp.float32)      # (TB, D)
    label = label_ref[...].astype(jnp.float32)    # (TB, D)

    # Per-row squared L2 norms.
    nf2 = jnp.sum(feat * feat, axis=1, keepdims=True)     # (TB, 1)
    nc2 = jnp.sum(label * label, axis=1, keepdims=True)   # (TB, 1)

    # Ragged last tile (and any clamped duplicate tile) handled in-kernel:
    # mask rows whose logical index is >= the true batch size.  Garbage/NaN
    # read from the padded region never propagates through the select.
    row0 = (i * pl.num_programs(1) + j) * tb
    rows = jax.lax.broadcasted_iota(jnp.int32, (tb, 1), 0) + row0
    valid = rows < nrows_ref[0]
    nf2 = jnp.where(valid, nf2, 0.0)
    nc2 = jnp.where(valid, nc2, 0.0)

    # Fused sqrt: ||f||*||c|| == sqrt(||f||^2 * ||c||^2).  NOTE: keep the
    # two-sqrt form instead if the product of squared norms could overflow f32.
    dot_ref[...] += jnp.sum(jnp.sqrt(nf2 * nc2), keepdims=True)   # (1, 1)
    a_ref[...] += jnp.sum(nf2, keepdims=True)                     # (1, 1)
    b_ref[...] += jnp.sum(nc2, keepdims=True)                     # (1, 1)


def _choose_tiling(batch, feature_dim, itemsize):
    """Rows per tile, sized against the real per-generation VMEM capacity."""
    try:
        vmem_cap = int(pltpu.get_tpu_info().vmem_capacity_bytes)
    except Exception:                       # fallback if query unavailable
        vmem_cap = 64 * 1024 * 1024         # conservative (v7x)
    budget = vmem_cap // 2                  # 2 inputs x 2 pipeline buffers
    vmem_limit = (vmem_cap * 3) // 4        # scoped limit, with headroom

    # Bytes one input row occupies in VMEM (lane dim padded to 128).
    row_bytes = pl.cdiv(feature_dim, 128) * 128 * itemsize
    tb = (budget // (4 * row_bytes)) // 8 * 8
    tb = max(8, tb)
    # No point in a tile larger than the (8-rounded) batch itself.
    tb = min(tb, max(8, pl.cdiv(batch, 8) * 8))
    # TODO(synk): for very large feature_dim (where even tb==8 exceeds the
    # budget) add an inner feature-dim grid axis with per-row nf2/nc2 partials
    # carried in (TB,1) scratch; not needed for typical embedding sizes.
    return tb, vmem_limit


def center_loss2_forward(feat, label):
    B, D = feat.shape
    assert label.shape == (B, D)
    itemsize = max(jnp.dtype(feat.dtype).itemsize,
                   jnp.dtype(label.dtype).itemsize)
    tb, vmem_limit = _choose_tiling(B, D, itemsize)

    nt = pl.cdiv(B, tb)                      # total row tiles
    p = min(_PARALLEL_CHUNKS, nt)            # parallel batch chunks
    t = pl.cdiv(nt, p)                       # tiles per chunk

    # Logical block index of grid point (i, j); clamped so every DMA stays in
    # bounds (fully-out-of-range duplicates are zeroed by the in-kernel mask).
    def in_index(i, j, _nrows):
        return (jnp.minimum(i * t + j, nt - 1), 0)

    def out_index(i, j, _nrows):
        return (i, 0)

    grid_spec = pltpu.PrefetchScalarGridSpec(
        num_scalar_prefetch=1,               # true batch size -> SMEM
        grid=(p, t),
        in_specs=[
            pl.BlockSpec((tb, D), in_index),
            pl.BlockSpec((tb, D), in_index),
        ],
        out_specs=[
            pl.BlockSpec((1, 1), out_index),
            pl.BlockSpec((1, 1), out_index),
            pl.BlockSpec((1, 1), out_index),
        ],
    )

    nrows = jnp.array([B], dtype=jnp.int32)
    dot_p, a_p, b_p = pl.pallas_call(
        functools.partial(_center_loss2_kernel, tb),
        out_shape=(
            jax.ShapeDtypeStruct((p, 1), jnp.float32),
            jax.ShapeDtypeStruct((p, 1), jnp.float32),
            jax.ShapeDtypeStruct((p, 1), jnp.float32),
        ),
        grid_spec=grid_spec,
        compiler_params=pltpu.CompilerParams(
            dimension_semantics=("parallel", "arbitrary"),
            vmem_limit_bytes=vmem_limit,
        ),
        cost_estimate=pl.CostEstimate(
            flops=8 * B * D,
            transcendentals=B,
            bytes_accessed=2 * B * D * itemsize + 3 * p * 4,
        ),
    )(nrows, feat, label)

    # 6-scalar combine (one partial per parallel chunk); exact algebraic match
    # of the reference formula after the D cancellation.
    return jnp.sum(dot_p) / (jnp.sqrt(jnp.sum(a_p)) * jnp.sqrt(jnp.sum(b_p)))


class CenterLoss2JAX:
    """JAX/Pallas port of CenterLoss2.  num_classes must be a valid norm axis
    for the 2-D (batch, feature) inputs, i.e. num_classes == 1 here."""

    def __init__(self, num_classes, feature_dim, key):
        self.num_classes = num_classes
        self.feature_dim = feature_dim
        # nn.Parameter(torch.randn(num_classes, feature_dim)) — kept for
        # parity; the reference forward never uses it.
        self.centers = jax.random.normal(key, (num_classes, feature_dim),
                                         dtype=jnp.float32)

    def forward(self, feat, label):
        return center_loss2_forward(feat, label)


def _reference(feat, label):
    # Pure-JAX replica of the original (broadcast-based) PyTorch formula.
    feat = feat.astype(jnp.float32)
    label = label.astype(jnp.float32)
    nf = jnp.sqrt(jnp.sum(feat * feat, axis=1, keepdims=True))
    nl = jnp.sqrt(jnp.sum(label * label, axis=1, keepdims=True))
    count = jnp.broadcast_to(nf, label.shape)
    center = jnp.broadcast_to(nl, label.shape)
    return jnp.sum(count * center) / (
        jnp.sqrt(jnp.sum(count ** 2)) * jnp.sqrt(jnp.sum(center ** 2)))


if __name__ == "__main__":
    key = jax.random.PRNGKey(0)
    k_centers, k_f1, k_l1, k_f2, k_l2, k_f3, k_l3 = jax.random.split(key, 7)

    batch, feature_dim, num_classes = 8, 32, 1
    module = CenterLoss2JAX(num_classes, feature_dim, k_centers)

    # Check 1: f32 inputs, batch a multiple of 8.
    feat = jax.random.normal(k_f1, (batch, feature_dim), dtype=jnp.float32)
    label = jax.random.normal(k_l1, (batch, feature_dim), dtype=jnp.float32)
    loss = module.forward(feat, label)
    jax.block_until_ready(loss)
    ref = _reference(feat, label)
    assert jnp.allclose(loss, ref, rtol=1e-5, atol=1e-6), (loss, ref)

    # Check 2: ragged batch (13 rows) -> exercises the in-kernel row mask
    # (no wrapper-side padding pass).
    feat2 = jax.random.normal(k_f2, (13, feature_dim), dtype=jnp.float32)
    label2 = jax.random.normal(k_l2, (13, feature_dim), dtype=jnp.float32)
    loss2 = module.forward(feat2, label2)
    jax.block_until_ready(loss2)
    ref2 = _reference(feat2, label2)
    assert jnp.allclose(loss2, ref2, rtol=1e-5, atol=1e-6), (loss2, ref2)

    # Check 3: bf16 inputs -> exercises the in-kernel per-tile f32 cast
    # (no wrapper-side upcast copy).
    feat3 = jax.random.normal(k_f3, (16, feature_dim)).astype(jnp.bfloat16)
    label3 = jax.random.normal(k_l3, (16, feature_dim)).astype(jnp.bfloat16)
    loss3 = module.forward(feat3, label3)
    jax.block_until_ready(loss3)
    ref3 = _reference(feat3, label3)
    assert jnp.allclose(loss3, ref3, rtol=1e-4, atol=1e-5), (loss3, ref3)

    print("KERNEL_OK")
</pallas_src>

<mosaic_0001>
module attributes {stable_mosaic.version = 11 : i64} {
  func.func @_center_loss2_kernel(%arg0: i32, %arg1: i32, %arg2: memref<1xi32, #tpu.memory_space<smem>>, %arg3: memref<8x32xf32, #tpu.memory_space<vmem>>, %arg4: memref<8x32xf32, #tpu.memory_space<vmem>>, %arg5: memref<1x1xf32, #tpu.memory_space<vmem>>, %arg6: memref<1x1xf32, #tpu.memory_space<vmem>>, %arg7: memref<1x1xf32, #tpu.memory_space<vmem>>) attributes {dimension_semantics = [#tpu.dimension_semantics<parallel>, #tpu.dimension_semantics<arbitrary>], iteration_bounds = array<i64: 1, 1>, scalar_prefetch = 1 : i64, scratch_operands = 0 : i64, tpu.core_type = #tpu.core_type<tc>, window_params = [{transform_indices = @transform_0, window_bounds = array<i64: 8, 32>}, {transform_indices = @transform_1, window_bounds = array<i64: 8, 32>}, {transform_indices = @transform_2, window_bounds = array<i64: 1, 1>}, {transform_indices = @transform_3, window_bounds = array<i64: 1, 1>}, {transform_indices = @transform_4, window_bounds = array<i64: 1, 1>}]} {
    %c0_i32 = arith.constant 0 : i32
    %0 = arith.cmpi eq, %arg1, %c0_i32 : i32
    %1 = arith.extui %0 : i1 to i32
    %c0_i32_0 = arith.constant 0 : i32
    %2 = arith.cmpi ne, %1, %c0_i32_0 : i32
    scf.if %2 {
      %cst_23 = arith.constant 0.000000e+00 : f32
      %50 = vector.broadcast %cst_23 : f32 to vector<1x1xf32>
      %c0_24 = arith.constant 0 : index
      %c0_25 = arith.constant 0 : index
      %51 = vector.load %arg5[%c0_24, %c0_25] : memref<1x1xf32, #tpu.memory_space<vmem>>, vector<1x1xf32>
      tpu.vector_store %arg5[%c0_24, %c0_25], %50 {strides = array<i32>} : memref<1x1xf32, #tpu.memory_space<vmem>>, vector<1x1xf32>,
      %cst_26 = arith.constant 0.000000e+00 : f32
      %52 = vector.broadcast %cst_26 : f32 to vector<1x1xf32>
      %c0_27 = arith.constant 0 : index
      %c0_28 = arith.constant 0 : index
      %53 = vector.load %arg6[%c0_27, %c0_28] : memref<1x1xf32, #tpu.memory_space<vmem>>, vector<1x1xf32>
      tpu.vector_store %arg6[%c0_27, %c0_28], %52 {strides = array<i32>} : memref<1x1xf32, #tpu.memory_space<vmem>>, vector<1x1xf32>,
      %cst_29 = arith.constant 0.000000e+00 : f32
      %54 = vector.broadcast %cst_29 : f32 to vector<1x1xf32>
      %c0_30 = arith.constant 0 : index
      %c0_31 = arith.constant 0 : index
      %55 = vector.load %arg7[%c0_30, %c0_31] : memref<1x1xf32, #tpu.memory_space<vmem>>, vector<1x1xf32>
      tpu.vector_store %arg7[%c0_30, %c0_31], %54 {strides = array<i32>} : memref<1x1xf32, #tpu.memory_space<vmem>>, vector<1x1xf32>,
    } else {
    }
    %c0 = arith.constant 0 : index
    %c0_1 = arith.constant 0 : index
    %3 = vector.load %arg3[%c0, %c0_1] : memref<8x32xf32, #tpu.memory_space<vmem>>, vector<8x32xf32>
    %c0_2 = arith.constant 0 : index
    %c0_3 = arith.constant 0 : index
    %4 = vector.load %arg4[%c0_2, %c0_3] : memref<8x32xf32, #tpu.memory_space<vmem>>, vector<8x32xf32>
    %5 = arith.mulf %3, %3 : vector<8x32xf32>
    %cst = arith.constant dense<0.000000e+00> : vector<8xf32>
    %6 = vector.multi_reduction <add>, %5, %cst [1] : vector<8x32xf32> to vector<8xf32>
    %7 = vector.shape_cast %6 : vector<8xf32> to vector<8x1xf32>
    %8 = arith.mulf %4, %4 : vector<8x32xf32>
    %cst_4 = arith.constant dense<0.000000e+00> : vector<8xf32>
    %9 = vector.multi_reduction <add>, %8, %cst_4 [1] : vector<8x32xf32> to vector<8xf32>
    %10 = vector.shape_cast %9 : vector<8xf32> to vector<8x1xf32>
    %c1_i32 = arith.constant 1 : i32
    %11 = arith.muli %arg0, %c1_i32 : i32
    %12 = arith.addi %11, %arg1 : i32
    %c8_i32 = arith.constant 8 : i32
    %13 = arith.muli %12, %c8_i32 : i32
    %14 = tpu.iota {dimensions = array<i32: 0>} : vector<8x1xi32>
    %15 = vector.broadcast %13 : i32 to vector<8x1xi32>
    %16 = arith.addi %14, %15 : vector<8x1xi32>
    %c0_5 = arith.constant 0 : index
    %17 = memref.load %arg2[%c0_5] : memref<1xi32, #tpu.memory_space<smem>>
    %18 = vector.broadcast %17 : i32 to vector<8x1xi32>
    %19 = arith.cmpi slt, %16, %18 : vector<8x1xi32>
    %cst_6 = arith.constant 0.000000e+00 : f32
    %20 = vector.broadcast %cst_6 : f32 to vector<8x1xf32>
    %21 = arith.select %19, %7, %20 : vector<8x1xi1>, vector<8x1xf32>
    %cst_7 = arith.constant 0.000000e+00 : f32
    %22 = vector.broadcast %cst_7 : f32 to vector<8x1xf32>
    %23 = arith.select %19, %10, %22 : vector<8x1xi1>, vector<8x1xf32>
    %c0_8 = arith.constant 0 : index
    %c0_9 = arith.constant 0 : index
    %24 = vector.load %arg5[%c0_8, %c0_9] : memref<1x1xf32, #tpu.memory_space<vmem>>, vector<1x1xf32>
    %25 = arith.mulf %21, %23 : vector<8x1xf32>
    %26 = math.sqrt %25 : vector<8x1xf32>
    %27 = vector.shape_cast %26 : vector<8x1xf32> to vector<1x8x1xf32>
    %cst_10 = arith.constant dense<0.000000e+00> : vector<1xf32>
    %28 = vector.multi_reduction <add>, %27, %cst_10 [1, 2] : vector<1x8x1xf32> to vector<1xf32>
    %29 = vector.shape_cast %28 : vector<1xf32> to vector<1x1x1xf32>
    %30 = vector.extract %29[0, 0, 0] : f32 from vector<1x1x1xf32>
    %31 = vector.broadcast %30 : f32 to vector<1x1xf32>
    %32 = arith.addf %24, %31 : vector<1x1xf32>
    %c0_11 = arith.constant 0 : index
    %c0_12 = arith.constant 0 : index
    %33 = vector.load %arg5[%c0_11, %c0_12] : memref<1x1xf32, #tpu.memory_space<vmem>>, vector<1x1xf32>
    tpu.vector_store %arg5[%c0_11, %c0_12], %32 {strides = array<i32>} : memref<1x1xf32, #tpu.memory_space<vmem>>, vector<1x1xf32>,
    %c0_13 = arith.constant 0 : index
    %c0_14 = arith.constant 0 : index
    %34 = vector.load %arg6[%c0_13, %c0_14] : memref<1x1xf32, #tpu.memory_space<vmem>>, vector<1x1xf32>
    %35 = vector.shape_cast %21 : vector<8x1xf32> to vector<1x8x1xf32>
    %cst_15 = arith.constant dense<0.000000e+00> : vector<1xf32>
    %36 = vector.multi_reduction <add>, %35, %cst_15 [1, 2] : vector<1x8x1xf32> to vector<1xf32>
    %37 = vector.shape_cast %36 : vector<1xf32> to vector<1x1x1xf32>
    %38 = vector.extract %37[0, 0, 0] : f32 from vector<1x1x1xf32>
    %39 = vector.broadcast %38 : f32 to vector<1x1xf32>
    %40 = arith.addf %34, %39 : vector<1x1xf32>
    %c0_16 = arith.constant 0 : index
    %c0_17 = arith.constant 0 : index
    %41 = vector.load %arg6[%c0_16, %c0_17] : memref<1x1xf32, #tpu.memory_space<vmem>>, vector<1x1xf32>
    tpu.vector_store %arg6[%c0_16, %c0_17], %40 {strides = array<i32>} : memref<1x1xf32, #tpu.memory_space<vmem>>, vector<1x1xf32>,
    %c0_18 = arith.constant 0 : index
    %c0_19 = arith.constant 0 : index
    %42 = vector.load %arg7[%c0_18, %c0_19] : memref<1x1xf32, #tpu.memory_space<vmem>>, vector<1x1xf32>
    %43 = vector.shape_cast %23 : vector<8x1xf32> to vector<1x8x1xf32>
    %cst_20 = arith.constant dense<0.000000e+00> : vector<1xf32>
    %44 = vector.multi_reduction <add>, %43, %cst_20 [1, 2] : vector<1x8x1xf32> to vector<1xf32>
    %45 = vector.shape_cast %44 : vector<1xf32> to vector<1x1x1xf32>
    %46 = vector.extract %45[0, 0, 0] : f32 from vector<1x1x1xf32>
    %47 = vector.broadcast %46 : f32 to vector<1x1xf32>
    %48 = arith.addf %42, %47 : vector<1x1xf32>
    %c0_21 = arith.constant 0 : index
    %c0_22 = arith.constant 0 : index
    %49 = vector.load %arg7[%c0_21, %c0_22] : memref<1x1xf32, #tpu.memory_space<vmem>>, vector<1x1xf32>
    tpu.vector_store %arg7[%c0_21, %c0_22], %48 {strides = array<i32>} : memref<1x1xf32, #tpu.memory_space<vmem>>, vector<1x1xf32>,
    return
  }
  func.func @transform_0(%arg0: i32, %arg1: i32, %arg2: memref<1xi32, #tpu.memory_space<smem>>) -> (i32, i32) {
    %c1_i32 = arith.constant 1 : i32
    %0 = arith.muli %arg0, %c1_i32 : i32
    %1 = arith.addi %0, %arg1 : i32
    %c0_i32 = arith.constant 0 : i32
    %2 = arith.minsi %1, %c0_i32 : i32
    %c0_i32_0 = arith.constant 0 : i32
    %c0_i32_1 = arith.constant 0 : i32
    return %2, %c0_i32_0 : i32, i32
  }
  func.func @transform_1(%arg0: i32, %arg1: i32, %arg2: memref<1xi32, #tpu.memory_space<smem>>) -> (i32, i32) {
    %c1_i32 = arith.constant 1 : i32
    %0 = arith.muli %arg0, %c1_i32 : i32
    %1 = arith.addi %0, %arg1 : i32
    %c0_i32 = arith.constant 0 : i32
    %2 = arith.minsi %1, %c0_i32 : i32
    %c0_i32_0 = arith.constant 0 : i32
    %c0_i32_1 = arith.constant 0 : i32
    return %2, %c0_i32_0 : i32, i32
  }
  func.func @transform_2(%arg0: i32, %arg1: i32, %arg2: memref<1xi32, #tpu.memory_space<smem>>) -> (i32, i32) {
    %c0_i32 = arith.constant 0 : i32
    %c0_i32_0 = arith.constant 0 : i32
    return %arg0, %c0_i32 : i32, i32
  }
  func.func @transform_3(%arg0: i32, %arg1: i32, %arg2: memref<1xi32, #tpu.memory_space<smem>>) -> (i32, i32) {
    %c0_i32 = arith.constant 0 : i32
    %c0_i32_0 = arith.constant 0 : i32
    return %arg0, %c0_i32 : i32, i32
  }
  func.func @transform_4(%arg0: i32, %arg1: i32, %arg2: memref<1xi32, #tpu.memory_space<smem>>) -> (i32, i32) {
    %c0_i32 = arith.constant 0 : i32
    %c0_i32_0 = arith.constant 0 : i32
    return %arg0, %c0_i32 : i32, i32
  }
}

</mosaic_0001>

<bundles_post_ra>
// kernel: tpu_custom_call.1
= control target key start
LH: loop header
LB: loop body
LE: loop exit
PB: predicated region body
PF: predicated region fallthrough
CT: control target
= control target key end

     0   :  { %12 = vsyncpa [#allocation5], 0  ;;  %s369_s0 = inlined_call_operand.<no memory space> [shape: s32[1], index: 0, kind: input, shape index: {}]   ;;  %s370_s1 = inlined_call_operand.hbm [shape: f32[8,32], index: 1, kind: input, shape index: {}]   ;;  %s371_s2 = inlined_call_operand.hbm [shape: f32[8,32], index: 2, kind: input, shape index: {}]   ;;  %s372_s3 = inlined_call_operand.hbm [shape: f32[1,1], index: 3, kind: output, shape index: {0}]   ;;  %s373_s4 = inlined_call_operand.hbm [shape: f32[1,1], index: 4, kind: output, shape index: {1}]   ;;  %s374_s5 = inlined_call_operand.hbm [shape: f32[1,1], index: 5, kind: output, shape index: {2}]  }
   0x1   :  { %13 = vsyncpa [#allocation8], 0 }
   0x2   :  { %14 = vsyncpa [#allocation6], 0 }
   0x3   :  { %15 = vsyncpa [#allocation11], 0  ;;  %s309_s18 = smov [#allocation4]   ;;  %s310_s20 = smov [#allocation7]  }
   0x4   :  { %s27_s19 = sshll.u32 %s309_s18, 4  ;;  %s42_s21 = sshll.u32 %s310_s20, 4  ;;  %s28_s19 = int_to_ptr.vmem [resolvable:$true] %s27_s19  ;;  %s43_s21 = int_to_ptr.vmem [resolvable:$true] %s42_s21 }
   0x5   :  { %s209_s22 = scalar_lea.vmem %s28_s19, 128  ;;  %p214_p1 = scmp.lt.s32.totalorder %s28_s19, %s28_s19 }
   0x6   :  { %p210_p0 = scmp.ne.s32.totalorder %s28_s19, %s209_s22  ;;  %p215_p2 = scmp.lt.s32.totalorder %s209_s22, %s209_s22 }
   0x8   :  { %p216_p3 = por %p215_p2, %p214_p1 }
   0xa   :  { %p217_p4 = pnand %p216_p3, %p210_p0 }
   0xc   :  { %220 = shalt.err (!%p217_p4)
}
   0xd   :  { %30 = dma.hbm_to_vmem [thread:$0]  %s370_s1, 128, %s28_s19, [#allocation5]  }
   0xe   :  { %s229_s25 = scalar_lea.vmem %s43_s21, 128  ;;  %p234_p6 = scmp.lt.s32.totalorder %s43_s21, %s43_s21 }
   0xf   :  { %p230_p5 = scmp.ne.s32.totalorder %s43_s21, %s229_s25  ;;  %p235_p7 = scmp.lt.s32.totalorder %s229_s25, %s229_s25 }
  0x11   :  { %p236_p8 = por %p235_p7, %p234_p6 }
  0x13   :  { %p237_p9 = pnand %p236_p8, %p230_p5 }
  0x15   :  { %240 = shalt.err (!%p237_p9)
}
  0x16   :  { %45 = dma.hbm_to_vmem [thread:$0]  %s371_s2, 128, %s43_s21, [#allocation8]  }
  0x17   :  { %301 = dma.done.wait [#allocation5], 128  }
  0x18   :  { %302 = vsyncadd [#allocation5], 4294967168 }
  0x19   :  { %303 = dma.done.wait [#allocation8], 128  }
  0x1a   :  { %304 = vsyncadd [#allocation8], 4294967168  ;;  %v66_v0 = vld [vmem:[#allocation4] sm:$0xff]  ;;  %vm69_vm0 = vcmask 261120   ;;  %v67_v1 = vld [vmem:[#allocation7] sm:$0xff]  ;;  %v79_v6 = vlaneseq  ;;  %v84_v8 = vstv %s369_s0  ;;  %vm97_vm2 = vcmask 7168  }
  0x1b   :  { %v68_v2 = vmul.f32 %v66_v0, %v66_v0  ;;  %v73_v3 = vmul.f32 %v67_v1, %v67_v1  ;;  %vm62_vm5 = vcmask 0   ;;  %v311_v22 = vmov 0.0   ;;  %s312_s2 = smov [#allocation9]   ;;  %s313_s30 = smov [#allocation10]  }
  0x1c   :  { %v80_v7 = vshrl.u32 %v79_v6, 7  ;;  %63 = vst.msk [vmem:[#allocation9] sm:$0x1] %vm62_vm5, %v311_v22  ;;  %64 = vst.msk [vmem:[#allocation10] sm:$0x1] %vm62_vm5, %v311_v22  ;;  %s146_s29 = sshll.u32 %s312_s2, 4  ;;  %s147_s29 = int_to_ptr.vmem [resolvable:$true] %s146_s29 }
  0x1d   :  { %v70_v4 = vsel %vm69_vm0, %v68_v2, 0.0  ;;  %v74_v5 = vsel %vm69_vm0, %v73_v3, 0.0  ;;  %65 = vst.msk [vmem:[#allocation12] sm:$0x1] %vm62_vm5, %v311_v22  ;;  %s156_s6 = sshll.u32 %s313_s30, 4  ;;  %s314_s8 = smov [#allocation12]   ;;  %s157_s6 = int_to_ptr.vmem [resolvable:$true] %s156_s6 }
  0x1e   :  { %71 = vadd.xlane.f32.xlu0 %v70_v4  ;;  %vm85_vm1 = vcmp.lt.s32.totalorder %v80_v7, %v84_v8  ;;  %s166_s9 = sshll.u32 %s314_s8, 4  ;;  %s241_s11 = scalar_lea.vmem %s147_s29, 16  ;;  %s167_s9 = int_to_ptr.vmem [resolvable:$true] %s166_s9 }
  0x1f   :  { %p242_p10 = scmp.ne.s32.totalorder %s147_s29, %s241_s11  ;;  %s245_s12 = scalar_lea.vmem %s147_s29, 32 }
  0x20   :  { %p246_p11 = scmp.lt.s32.totalorder %s147_s29, %s147_s29  ;;  %p247_p12 = scmp.lt.s32.totalorder %s245_s12, %s241_s11 }
  0x22   :  { %75 = vadd.xlane.f32.xlu0 %v74_v5  ;;  %p248_p13 = por %p247_p12, %p246_p11 }
  0x23   :  { %v88_v44 = vld [vmem:[#allocation9] sm:$0x1]  ;;  %v112_v47 = vld [vmem:[#allocation10] sm:$0x1] }
  0x24   :  { %v126_v48 = vld [vmem:[#allocation12] sm:$0x1]  ;;  %p249_p0 = pnand %p248_p13, %p242_p10 }
  0xa7   :  { %v72_v9 = vpop.xlane.xlu0 %71 }
  0xa8   :  { %v86_v11 = vsel %vm85_vm1, %v72_v9, 0.0 }
  0xa9   :  { %v113_v21 = vsel %vm97_vm2, %v86_v11, 0.0 }
  0xab   :  { %v76_v10 = vpop.xlane.xlu0 %75 }
  0xac   :  { %v87_v12 = vsel %vm85_vm1, %v76_v10, 0.0 }
  0xad   :  { %v89_v13 = vmul.f32 %v87_v12, %v86_v11  ;;  %v127_v14 = vsel %vm97_vm2, %v87_v12, 0.0 }
  0xae   :  { %128 = vadd.xlane.f32.xlu0 %v127_v14 }
  0xaf   :  { %199 = vrsqrt.f32 %v89_v13  ;;  %vm92_vm3 = vcmp.eq.f32.partialorder %v89_v13, inf  ;;  %v95_v17 = vand.u32 2147483648, %v89_v13  ;;  %vm94_vm4 = vcmp.eq.f32.partialorder %v89_v13, 0.0 }
  0xbc   :  { %v200_v15 = vpop.eup %199 }
  0xbd   :  { %v91_v16 = vmul.f32 %v200_v15, %v89_v13 }
  0xbf   :  { %v93_v18 = vsel %vm92_vm3, %v89_v13, %v91_v16 }
  0xc0   :  { %v96_v19 = vsel %vm94_vm4, %v95_v17, %v93_v18 }
  0xc1   :  { %v98_v20 = vsel %vm97_vm2, %v96_v19, 0.0 }
  0xc2   :  { %99 = vadd.xlane.f32.xlu1 %v98_v20 }
  0xc6   :  { %114 = vadd.xlane.f32.xlu1 %v113_v21 }
 0x137   :  { %v129_v23 = vpop.xlane.xlu0 %128 }
 0x138   :  { %v130_v24 = vrot.slane %v129_v23, 4 }
 0x13a   :  { %v131_v25 = vadd.f32 %v130_v24, %v129_v23 }
 0x13c   :  { %v132_v29 = vrot.slane %v131_v25, 2 }
 0x13e   :  { %v133_v35 = vadd.f32 %v132_v29, %v131_v25 }
 0x140   :  { %v134_v40 = vrot.slane %v133_v35, 1 }
 0x142   :  { %v135_v43 = vadd.f32 %v134_v40, %v133_v35 }
 0x14b   :  { %v100_v26 = vpop.xlane.xlu1 %99 }
 0x14c   :  { %v101_v27 = vrot.slane %v100_v26, 4 }
 0x14e   :  { %v102_v28 = vadd.f32 %v101_v27, %v100_v26 }
 0x14f   :  { %v115_v30 = vpop.xlane.xlu1 %114 }
 0x150   :  { %v103_v31 = vrot.slane %v102_v28, 2  ;;  %v116_v32 = vrot.slane %v115_v30, 4 }
 0x152   :  { %v117_v33 = vadd.f32 %v116_v32, %v115_v30  ;;  %v104_v34 = vadd.f32 %v103_v31, %v102_v28 }
 0x154   :  { %v118_v36 = vrot.slane %v117_v33, 2  ;;  %v105_v37 = vrot.slane %v104_v34, 1 }
 0x156   :  { %v119_v38 = vadd.f32 %v118_v36, %v117_v33  ;;  %v106_v39 = vadd.f32 %v105_v37, %v104_v34 }
 0x158   :  { %187 = vpush %v106_v39  ;;  %v120_v41 = vrot.slane %v119_v38, 1 }
 0x15a   :  { %v121_v42 = vadd.f32 %v120_v41, %v119_v38 }
 0x15c   :  { %189 = vpush %v121_v42 }
 0x15d   :  { %191 = vpush %v135_v43 }
 0x189   :  { %s188_s0 = spop %187 }
 0x18a   :  { %v108_v45 = vstv %s188_s0 }
 0x18b   :  { %v109_v46 = vadd.f32 %v108_v45, %v88_v44 }
 0x18d   :  { %111 = vst.msk [vmem:[#allocation9] sm:$0x1] %vm62_vm5, %v109_v46  ;;  %s190_s7 = spop %189 }
 0x18e   :  { %v123_v49 = vstv %s190_s7  ;;  %s192_s10 = spop %191 }
 0x18f   :  { %v124_v50 = vadd.f32 %v123_v49, %v112_v47  ;;  %v137_v51 = vstv %s192_s10 }
 0x190   :  { %252 = shalt.err (!%p249_p0)
}
 0x191   :  { %149 = dma.vmem_to_hbm [thread:$0]  %s147_s29, 16, %s372_s3, [#allocation6]   ;;  %v138_v52 = vadd.f32 %v137_v51, %v126_v48  ;;  %125 = vst.msk [vmem:[#allocation10] sm:$0x1] %vm62_vm5, %v124_v50 }
 0x192   :  { %s261_s15 = scalar_lea.vmem %s157_s6, 16  ;;  %s265_s16 = scalar_lea.vmem %s157_s6, 32 }
 0x193   :  { %139 = vst.msk [vmem:[#allocation12] sm:$0x1] %vm62_vm5, %v138_v52  ;;  %p262_p1 = scmp.ne.s32.totalorder %s157_s6, %s261_s15  ;;  %p266_p2 = scmp.lt.s32.totalorder %s157_s6, %s157_s6 }
 0x194   :  { %p267_p3 = scmp.lt.s32.totalorder %s265_s16, %s261_s15 }
 0x196   :  { %p268_p4 = por %p267_p3, %p266_p2 }
 0x198   :  { %p269_p5 = pnand %p268_p4, %p262_p1 }
 0x19a   :  { %272 = shalt.err (!%p269_p5)
}
 0x19b   :  { %159 = dma.vmem_to_hbm [thread:$0]  %s157_s6, 16, %s373_s4, [#allocation11]  }
 0x19c   :  { %s281_s19 = scalar_lea.vmem %s167_s9, 16  ;;  %s285_s3 = scalar_lea.vmem %s167_s9, 32 }
 0x19d   :  { %p282_p6 = scmp.ne.s32.totalorder %s167_s9, %s281_s19  ;;  %p286_p7 = scmp.lt.s32.totalorder %s167_s9, %s167_s9 }
 0x19e   :  { %p287_p8 = scmp.lt.s32.totalorder %s285_s3, %s281_s19 }
 0x1a0   :  { %p288_p9 = por %p287_p8, %p286_p7 }
 0x1a2   :  { %p289_p10 = pnand %p288_p9, %p282_p6 }
 0x1a4   :  { %292 = shalt.err (!%p289_p10)
}
 0x1a5   :  { %169 = dma.vmem_to_hbm [thread:$0]  %s167_s9, 16, %s374_s5, [#allocation11]  }
 0x1a6   :  { %305 = dma.done.wait [#allocation6], 16  }
 0x1a7   :  { %306 = vsyncadd [#allocation6], 4294967280 }
 0x1a8   :  { %307 = dma.done.wait [#allocation11], 32  }
 0x1a9   :  { %308 = vsyncadd [#allocation11], 4294967264 }
 0x1aa   :  { %179 = vsyncpa [#allocation5], 1 }
 0x1ab   :  { %180 = vsyncpa [#allocation8], 1 }
 0x1ac   :  { %181 = vsyncpa [#allocation6], 1 }
 0x1ad   :  { %182 = vsyncpa [#allocation11], 1 }

</bundles_post_ra>
